<compile_context>
chip_gen: v7x
topology: tpu7x:2x2x1
jax: 0.10.0
libtpu: 0.0.40
codegen_flags: <defaults>
</compile_context>

<pallas_src>
import numpy as np
import jax
import jax.numpy as jnp
from jax.experimental import pallas as pl
from jax.experimental.pallas import tpu as pltpu


def _softplus(z):
    # numerically stable softplus = log(1 + exp(z))
    return jnp.logaddexp(z, 0.0)


def _make_between_kernel(t_upper0):
    t0 = float(t_upper0)

    def kernel(x_ref, m_ref, c_ref, o_ref):
        x = x_ref[...].astype(jnp.float32)      # (TB, TD)
        m = m_ref[...]                          # (1, TD) -> broadcast over batch
        c = c_ref[...]                          # (1, TD) per-column upper const

        # Branch A columns need the extra lower clamp first; branch B passes x
        # straight through to the shared final clamp.
        y = jnp.where(m > 0.5, _softplus(x - t0) + t0, x)
        out = c - _softplus(c - y)              # c - softplus(c - y) for both branches
        o_ref[...] = out.astype(o_ref.dtype)

    return kernel


def _pick_tile(dim, target, align):
    """Full dim if it is small, otherwise the largest aligned tile <= target."""
    if dim <= target:
        return dim
    return max(align, (target // align) * align)


def between_forward(x, ixs1, ixs_less_than,
                    threshold_upper=(-1.0, 1.0), threshold_lower=-10.0):
    """JAX/Pallas equivalent of Between.forward.

    x: [B, D] float array. Returns [B, len(ixs1)+len(ixs_less_than)] with the
    same column order as torch.cat(...)[:, reverse_transform].
    """
    ixs1 = [int(i) for i in ixs1]
    ixs_less_than = [int(i) for i in ixs_less_than]
    forward = np.array(ixs1 + ixs_less_than, dtype=np.int64)
    # Same implicit assumption as the PyTorch original; assert so a silent
    # ambiguity in argsort cannot slip through.
    assert len(set(forward.tolist())) == len(forward), \
        "ixs1 and ixs_less_than must be disjoint"

    # Output column j reads x[:, sorted_cols[j]]; branch A iff that column is
    # in ixs1.  (forward[argsort(forward)] == sorted(forward).)
    sorted_cols = np.sort(forward)
    is_a = np.isin(sorted_cols, np.array(ixs1, dtype=np.int64))

    B = x.shape[0]
    Dp = sorted_cols.shape[0]

    # Single gather in final output order; skipped entirely when the index
    # sets cover all of x's columns in order.
    if Dp == x.shape[1] and np.array_equal(sorted_cols, np.arange(x.shape[1])):
        xg = x
    else:
        xg = x[:, sorted_cols]

    t0 = float(threshold_upper[0])
    t1 = float(threshold_upper[1])
    tl = float(threshold_lower)

    mask = jnp.asarray(is_a.astype(np.float32)).reshape(1, Dp)
    c_vec = jnp.asarray(np.where(is_a, t1, tl).astype(np.float32)).reshape(1, Dp)

    # ~2 MiB f32 tiles: with double-buffered input + output this stays well
    # under every generation's scoped-VMEM default (v5e 16 MiB, v7x 32/64 MiB).
    TB = _pick_tile(B, 512, 8)      # sublane tile (multiple of 8 or full dim)
    TD = _pick_tile(Dp, 1024, 128)  # lane tile (multiple of 128 or full dim)
    grid = (pl.cdiv(B, TB), pl.cdiv(Dp, TD))

    itemsize = np.dtype(x.dtype).itemsize
    cost = pl.CostEstimate(
        flops=8 * B * Dp,
        transcendentals=4 * B * Dp,                       # 2 softplus/elem ~ exp+log
        bytes_accessed=2 * B * Dp * itemsize + 2 * Dp * 4,
    )

    kernel = _make_between_kernel(t0)

    y = pl.pallas_call(
        kernel,
        out_shape=jax.ShapeDtypeStruct((B, Dp), x.dtype),
        grid=grid,
        in_specs=[
            pl.BlockSpec((TB, TD), lambda i, j: (i, j)),
            pl.BlockSpec((1, TD), lambda i, j: (0, j)),
            pl.BlockSpec((1, TD), lambda i, j: (0, j)),
        ],
        out_specs=pl.BlockSpec((TB, TD), lambda i, j: (i, j)),
        compiler_params=pltpu.CompilerParams(
            dimension_semantics=("parallel", "parallel"),
            vmem_limit_bytes=32 * 1024 * 1024,
        ),
        cost_estimate=cost,
    )(xg, mask, c_vec)

    return y


def _reference_forward(x, ixs1, ixs_less_than, threshold_upper, threshold_lower):
    # Pure-JAX reference mirroring the PyTorch code exactly.
    forward_transform = np.array(list(ixs1) + list(ixs_less_than))
    reverse_transform = np.argsort(forward_transform)
    split1 = x[:, np.array(ixs1)]
    split2 = x[:, np.array(ixs_less_than)]
    greater_than = jax.nn.softplus(split1 - threshold_upper[0]) + threshold_upper[0]
    less_than = -jax.nn.softplus(-greater_than + threshold_upper[1]) + threshold_upper[1]
    restricted2 = -jax.nn.softplus(-split2 + threshold_lower) + threshold_lower
    return jnp.concatenate((less_than, restricted2), axis=1)[:, reverse_transform]


if __name__ == "__main__":
    key = jax.random.PRNGKey(0)
    B, D = 2, 8
    x = jax.random.normal(key, (B, D), dtype=jnp.float32) * 3.0

    threshold_upper = (-1.0, 1.0)
    threshold_lower = -10.0

    # Case 1: indices cover all columns (no gather path).
    ixs1 = [0, 2, 4, 6]
    ixs_less_than = [1, 3, 5, 7]
    out1 = jax.block_until_ready(
        between_forward(x, ixs1, ixs_less_than, threshold_upper, threshold_lower))
    ref1 = _reference_forward(x, ixs1, ixs_less_than, threshold_upper, threshold_lower)
    np.testing.assert_allclose(np.asarray(out1), np.asarray(ref1), rtol=1e-5, atol=1e-5)

    # Case 2: partial, out-of-order indices (single-gather path).
    ixs1_b = [5, 1]
    ixs_less_than_b = [3, 7, 0]
    out2 = jax.block_until_ready(
        between_forward(x, ixs1_b, ixs_less_than_b, threshold_upper, threshold_lower))
    ref2 = _reference_forward(x, ixs1_b, ixs_less_than_b, threshold_upper, threshold_lower)
    np.testing.assert_allclose(np.asarray(out2), np.asarray(ref2), rtol=1e-5, atol=1e-5)

    print("KERNEL_OK")
</pallas_src>

<mosaic_0001>
module attributes {stable_mosaic.version = 11 : i64} {
  func.func @kernel(%arg0: i32, %arg1: i32, %arg2: memref<2x8xf32, #tpu.memory_space<vmem>>, %arg3: memref<1x8xf32, #tpu.memory_space<vmem>>, %arg4: memref<1x8xf32, #tpu.memory_space<vmem>>, %arg5: memref<2x8xf32, #tpu.memory_space<vmem>>) attributes {dimension_semantics = [#tpu.dimension_semantics<parallel>, #tpu.dimension_semantics<parallel>], iteration_bounds = array<i64: 1, 1>, scalar_prefetch = 0 : i64, scratch_operands = 0 : i64, tpu.core_type = #tpu.core_type<tc>, window_params = [{transform_indices = @transform_0, window_bounds = array<i64: 2, 8>}, {transform_indices = @transform_1, window_bounds = array<i64: 1, 8>}, {transform_indices = @transform_2, window_bounds = array<i64: 1, 8>}, {transform_indices = @transform_3, window_bounds = array<i64: 2, 8>}]} {
    %c0 = arith.constant 0 : index
    %c0_0 = arith.constant 0 : index
    %0 = vector.load %arg2[%c0, %c0_0] : memref<2x8xf32, #tpu.memory_space<vmem>>, vector<2x8xf32>
    %c0_1 = arith.constant 0 : index
    %c0_2 = arith.constant 0 : index
    %1 = vector.load %arg3[%c0_1, %c0_2] : memref<1x8xf32, #tpu.memory_space<vmem>>, vector<1x8xf32>
    %c0_3 = arith.constant 0 : index
    %c0_4 = arith.constant 0 : index
    %2 = vector.load %arg4[%c0_3, %c0_4] : memref<1x8xf32, #tpu.memory_space<vmem>>, vector<1x8xf32>
    %cst = arith.constant 5.000000e-01 : f32
    %3 = vector.broadcast %cst : f32 to vector<1x8xf32>
    %4 = arith.cmpf ogt, %1, %3 : vector<1x8xf32>
    %cst_5 = arith.constant -1.000000e+00 : f32
    %5 = vector.broadcast %cst_5 : f32 to vector<2x8xf32>
    %6 = arith.subf %0, %5 : vector<2x8xf32>
    %cst_6 = arith.constant 0.000000e+00 : f32
    %7 = vector.broadcast %cst_6 : f32 to vector<2x8xf32>
    %8 = arith.maximumf %6, %7 : vector<2x8xf32>
    %9 = vector.broadcast %cst_6 : f32 to vector<2x8xf32>
    %10 = arith.subf %6, %9 : vector<2x8xf32>
    %11 = arith.cmpf one, %10, %10 : vector<2x8xf32>
    %12 = vector.broadcast %cst_6 : f32 to vector<2x8xf32>
    %13 = arith.addf %6, %12 : vector<2x8xf32>
    %14 = math.absf %10 : vector<2x8xf32>
    %cst_7 = arith.constant 0.000000e+00 : f32
    %15 = vector.broadcast %cst_7 : f32 to vector<2x8xf32>
    %16 = arith.subf %15, %14 : vector<2x8xf32>
    %17 = math.exp %16 : vector<2x8xf32>
    %18 = math.log1p %17 : vector<2x8xf32>
    %19 = arith.addf %8, %18 : vector<2x8xf32>
    %20 = arith.select %11, %13, %19 : vector<2x8xi1>, vector<2x8xf32>
    %cst_8 = arith.constant -1.000000e+00 : f32
    %21 = vector.broadcast %cst_8 : f32 to vector<2x8xf32>
    %22 = arith.addf %20, %21 : vector<2x8xf32>
    %23 = vector.shape_cast %4 : vector<1x8xi1> to vector<1x8xi1>
    %24 = vector.broadcast %23 : vector<1x8xi1> to vector<2x8xi1>
    %25 = arith.select %24, %22, %0 : vector<2x8xi1>, vector<2x8xf32>
    %26 = vector.broadcast %2 : vector<1x8xf32> to vector<2x8xf32>
    %27 = arith.subf %26, %25 : vector<2x8xf32>
    %cst_9 = arith.constant 0.000000e+00 : f32
    %28 = vector.broadcast %cst_9 : f32 to vector<2x8xf32>
    %29 = arith.maximumf %27, %28 : vector<2x8xf32>
    %30 = vector.broadcast %cst_9 : f32 to vector<2x8xf32>
    %31 = arith.subf %27, %30 : vector<2x8xf32>
    %32 = arith.cmpf one, %31, %31 : vector<2x8xf32>
    %33 = vector.broadcast %cst_9 : f32 to vector<2x8xf32>
    %34 = arith.addf %27, %33 : vector<2x8xf32>
    %35 = math.absf %31 : vector<2x8xf32>
    %cst_10 = arith.constant 0.000000e+00 : f32
    %36 = vector.broadcast %cst_10 : f32 to vector<2x8xf32>
    %37 = arith.subf %36, %35 : vector<2x8xf32>
    %38 = math.exp %37 : vector<2x8xf32>
    %39 = math.log1p %38 : vector<2x8xf32>
    %40 = arith.addf %29, %39 : vector<2x8xf32>
    %41 = arith.select %32, %34, %40 : vector<2x8xi1>, vector<2x8xf32>
    %42 = vector.broadcast %2 : vector<1x8xf32> to vector<2x8xf32>
    %43 = arith.subf %42, %41 : vector<2x8xf32>
    %c0_11 = arith.constant 0 : index
    %c0_12 = arith.constant 0 : index
    %44 = vector.load %arg5[%c0_11, %c0_12] : memref<2x8xf32, #tpu.memory_space<vmem>>, vector<2x8xf32>
    tpu.vector_store %arg5[%c0_11, %c0_12], %43 {strides = array<i32>} : memref<2x8xf32, #tpu.memory_space<vmem>>, vector<2x8xf32>,
    return
  }
  func.func @transform_0(%arg0: i32, %arg1: i32) -> (i32, i32) {
    %c0_i32 = arith.constant 0 : i32
    return %arg0, %arg1 : i32, i32
  }
  func.func @transform_1(%arg0: i32, %arg1: i32) -> (i32, i32) {
    %c0_i32 = arith.constant 0 : i32
    %c0_i32_0 = arith.constant 0 : i32
    return %c0_i32, %arg1 : i32, i32
  }
  func.func @transform_2(%arg0: i32, %arg1: i32) -> (i32, i32) {
    %c0_i32 = arith.constant 0 : i32
    %c0_i32_0 = arith.constant 0 : i32
    return %c0_i32, %arg1 : i32, i32
  }
  func.func @transform_3(%arg0: i32, %arg1: i32) -> (i32, i32) {
    %c0_i32 = arith.constant 0 : i32
    return %arg0, %arg1 : i32, i32
  }
}

</mosaic_0001>

<bundles_post_ra>
// kernel: tpu_custom_call.1
= control target key start
LH: loop header
LB: loop body
LE: loop exit
PB: predicated region body
PF: predicated region fallthrough
CT: control target
= control target key end

     0   :  { %8 = vsyncpa [#allocation3], 0  ;;  %s215_s0 = inlined_call_operand.hbm [shape: f32[2,8], index: 0, kind: input, shape index: {}]   ;;  %s216_s1 = inlined_call_operand.vmem [shape: f32[1,8], index: 1, kind: input, shape index: {}]   ;;  %s217_s2 = inlined_call_operand.vmem [shape: f32[1,8], index: 2, kind: input, shape index: {}]   ;;  %s218_s3 = inlined_call_operand.hbm [shape: f32[2,8], index: 3, kind: output, shape index: {}]  }
   0x1   :  { %9 = vsyncpa [#allocation4], 0  ;;  %s162_s12 = smov [#allocation2]   ;;  %s114_s16 = scalar_lea.hbm %s215_s0, 32 }
   0x2   :  { %s16_s13 = sshll.u32 %s162_s12, 4  ;;  %p115_p0 = scmp.ne.s32.totalorder %s215_s0, %s114_s16  ;;  %s17_s13 = int_to_ptr.vmem [resolvable:$true] %s16_s13 }
   0x3   :  { %p118_p1 = scmp.lt.u32.totalorder %s114_s16, %s215_s0 }
   0x5   :  { %p120_p2 = pnand %p118_p1, %p115_p0 }
   0x7   :  { %123 = shalt.err (!%p120_p2)
}
   0x8   :  { %s124_s21 = scalar_lea.vmem %s17_s13, 32  ;;  %p129_p4 = scmp.lt.s32.totalorder %s17_s13, %s17_s13 }
   0x9   :  { %p125_p3 = scmp.ne.s32.totalorder %s17_s13, %s124_s21  ;;  %p130_p5 = scmp.lt.s32.totalorder %s124_s21, %s124_s21 }
   0xb   :  { %p131_p6 = por %p130_p5, %p129_p4 }
   0xd   :  { %p132_p7 = pnand %p131_p6, %p125_p3 }
   0xf   :  { %135 = shalt.err (!%p132_p7)
}
  0x10   :  { %19 = dma.hbm_to_vmem [thread:$0]  %s215_s0, 32, %s17_s13, [#allocation3]  }
  0x11   :  { %158 = dma.done.wait [#allocation3], 32  }
  0x12   :  { %159 = vsyncadd [#allocation3], 4294967264  ;;  %v27_v0 = vld [vmem:[#allocation2] sm:$0x3]  ;;  %v52_v7 = vlaneseq  ;;  %v163_v15 = vmov 0   ;;  %vm84_vm6 = vcmask 58368  }
  0x13   :  { %v101_v1 = vadd.f32 1.0, %v27_v0  ;;  %v28_v9 = vld [vmem:[%s216_s1] sm:$0x1] }
  0x14   :  { %v53_v10 = vshrl.u32 %v52_v7, 7  ;;  %vm30_vm0 = vcmp.gt.f32.partialorder %v28_v9, 0.5  ;;  %v102_v24 = vld [vmem:[%s217_s2] ss:$0 sm:$0xff]  ;;  %s164_s2 = smov [#allocation5]  }
  0x15   :  { %v35_v2 = vand.u32 2147483647, %v101_v1  ;;  %v51_v16 = vsel %vm30_vm0, 1, %v163_v15  ;;  %v32_v18 = vmax.f32 %v101_v1, 0.0  ;;  %vm33_vm2 = vcmp.ne.f32.partialorder %v101_v1, %v101_v1  ;;  %s92_s26 = sshll.u32 %s164_s2, 4  ;;  %s93_s26 = int_to_ptr.vmem [resolvable:$true] %s92_s26 }
  0x16   :  { %v54_v13 = vsub.s32 0, %v53_v10  ;;  %s136_s27 = scalar_lea.vmem %s93_s26, 32  ;;  %p141_p9 = scmp.lt.s32.totalorder %s93_s26, %s93_s26 }
  0x17   :  { %v36_v3 = vsub.f32 0.0, %v35_v2  ;;  %p137_p8 = scmp.ne.s32.totalorder %s93_s26, %s136_s27  ;;  %p142_p10 = scmp.lt.s32.totalorder %s136_s27, %s136_s27 }
  0x18   :  { %v55_v20 = vrot.slane %v51_v16, %v54_v13 }
  0x19   :  { %v37_v4 = vmul.f32 1.442695, %v36_v3  ;;  %p143_p11 = por %p142_p10, %p141_p9 }
  0x1a   :  { %vm56_vm3 = vcmp.eq.s32.totalorder %v55_v20, 1 }
  0x1b   :  { %106 = vpow2.f32 %v37_v4  ;;  %p144_p12 = pnand %p143_p11, %p137_p8 }
  0x25   :  { %v107_v5 = vpop.eup %106 }
  0x26   :  { %v39_v6 = vadd.f32 1.0, %v107_v5  ;;  %v42_v8 = vmul.f32 -0.5, %v107_v5  ;;  %v45_v12 = vand.u32 2147483647, %v107_v5 }
  0x28   :  { %108 = vlog2.f32 %v39_v6  ;;  %v43_v11 = vadd.f32 1.0, %v42_v8  ;;  %vm46_vm1 = vcmp.lt.f32.partialorder %v45_v12, 0.0004427343 }
  0x2a   :  { %v44_v14 = vmul.f32 %v107_v5, %v43_v11 }
  0x32   :  { %v109_v17 = vpop.eup %108 }
  0x33   :  { %v41_v19 = vmul.f32 0.6931472, %v109_v17 }
  0x35   :  { %v47_v21 = vsel %vm46_vm1, %v44_v14, %v41_v19 }
  0x36   :  { %v48_v22 = vadd.f32 %v47_v21, %v32_v18 }
  0x38   :  { %v49_v23 = vsel %vm33_vm2, %v101_v1, %v48_v22 }
  0x39   :  { %v50_v25 = vadd.f32 -1.0, %v49_v23 }
  0x3b   :  { %v57_v26 = vsel %vm56_vm3, %v50_v25, %v27_v0 }
  0x3c   :  { %v64_v27 = vsub.f32 %v102_v24, %v57_v26 }
  0x3e   :  { %v68_v28 = vand.u32 2147483647, %v64_v27  ;;  %v65_v38 = vmax.f32 %v64_v27, 0.0  ;;  %vm66_vm5 = vcmp.ne.f32.partialorder %v64_v27, %v64_v27 }
  0x40   :  { %v69_v29 = vsub.f32 0.0, %v68_v28 }
  0x42   :  { %v70_v30 = vmul.f32 1.442695, %v69_v29 }
  0x44   :  { %110 = vpow2.f32 %v70_v30 }
  0x4e   :  { %v111_v31 = vpop.eup %110 }
  0x4f   :  { %v72_v32 = vadd.f32 1.0, %v111_v31  ;;  %v75_v33 = vmul.f32 -0.5, %v111_v31  ;;  %v78_v35 = vand.u32 2147483647, %v111_v31 }
  0x51   :  { %112 = vlog2.f32 %v72_v32  ;;  %v76_v34 = vadd.f32 1.0, %v75_v33  ;;  %vm79_vm4 = vcmp.lt.f32.partialorder %v78_v35, 0.0004427343 }
  0x53   :  { %v77_v36 = vmul.f32 %v111_v31, %v76_v34 }
  0x5b   :  { %v113_v37 = vpop.eup %112 }
  0x5c   :  { %v74_v39 = vmul.f32 0.6931472, %v113_v37 }
  0x5e   :  { %v80_v40 = vsel %vm79_vm4, %v77_v36, %v74_v39 }
  0x5f   :  { %v81_v41 = vadd.f32 %v80_v40, %v65_v38 }
  0x61   :  { %v82_v42 = vsel %vm66_vm5, %v64_v27, %v81_v41 }
  0x62   :  { %v83_v43 = vsub.f32 %v102_v24, %v82_v42 }
  0x64   :  { %85 = vst.msk [vmem:[#allocation5] sm:$0x3] %vm84_vm6, %v83_v43 }
  0x65   :  { %147 = shalt.err (!%p144_p12)
}
  0x66   :  { %s148_s30 = scalar_lea.hbm %s218_s3, 32 }
  0x67   :  { %p149_p13 = scmp.ne.s32.totalorder %s218_s3, %s148_s30  ;;  %p152_p0 = scmp.lt.u32.totalorder %s148_s30, %s218_s3 }
  0x69   :  { %p154_p1 = pnand %p152_p0, %p149_p13 }
  0x6b   :  { %157 = shalt.err (!%p154_p1)
}
  0x6c   :  { %95 = dma.vmem_to_hbm [thread:$0]  %s93_s26, 32, %s218_s3, [#allocation4]  }
  0x6d   :  { %160 = dma.done.wait [#allocation4], 32  }
  0x6e   :  { %161 = vsyncadd [#allocation4], 4294967264 }
  0x6f   :  { %99 = vsyncpa [#allocation3], 1 }
  0x70   :  { %100 = vsyncpa [#allocation4], 1 }

</bundles_post_ra>
